<compile_context>
chip_gen: v6e
topology: v6e:2x2x1
jax: 0.10.0
libtpu: 0.0.40
codegen_flags: <defaults>
</compile_context>

<pallas_src>
import functools

import jax
import jax.numpy as jnp
from jax.experimental import pallas as pl
from jax.experimental.pallas import tpu as pltpu


def _mha_kernel(x_ref, wqkv_t_ref, bqkv_ref, wo_t_ref, bo_ref, o_ref,
                *, num_heads: int, head_dim: int, b_tile: int,
                n_patches: int, matmul_dtype):
    """Multi-head self-attention over a tile of b_tile batch elements.

    x_ref     : (b_tile, P, C)  input patches for this batch tile
    wqkv_t_ref: (C, 3C)         qkv weight, pre-transposed, Q columns pre-scaled
    bqkv_ref  : (1, 3C)         qkv bias, Q entries pre-scaled
    wo_t_ref  : (C, C)          out_proj weight, pre-transposed (in, out)
    bo_ref    : (1, C)          out_proj bias
    o_ref     : (b_tile, P, C)  output
    """
    c = num_heads * head_dim
    rows = b_tile * n_patches
    mm_dtype = matmul_dtype

    # Flatten the batch tile so the projection matmul has M = b_tile * P rows.
    x = x_ref[...].reshape(rows, c).astype(mm_dtype)

    # QKV projection (weights already transposed + Q-scale folded in wrapper).
    qkv = jnp.dot(x, wqkv_t_ref[...].astype(mm_dtype),
                  preferred_element_type=jnp.float32)
    qkv = qkv + bqkv_ref[...]                                   # (rows, 3C) f32

    # Feature index = s*C + h*hd + d, matching torch reshape(..., 3, H, hd).
    q_all = qkv[:, 0 * c:1 * c].reshape(b_tile, n_patches, c)   # pre-scaled Q
    k_all = qkv[:, 1 * c:2 * c].reshape(b_tile, n_patches, c)
    v_all = qkv[:, 2 * c:3 * c].reshape(b_tile, n_patches, c)

    wo_t = wo_t_ref[...].astype(mm_dtype)                       # (C, C)

    # Fused, lane-dense (rows, C) accumulator for the output projection;
    # avoids concatenating narrow (rows, hd) head outputs.
    out_acc = jnp.zeros((rows, c), jnp.float32)

    for h in range(num_heads):
        lo, hi = h * head_dim, (h + 1) * head_dim
        q = q_all[:, :, lo:hi].astype(mm_dtype)                 # (B, P, hd)
        k = k_all[:, :, lo:hi].astype(mm_dtype)                 # (B, P, hd)
        v = v_all[:, :, lo:hi].astype(mm_dtype)                 # (B, P, hd)

        # Batched attention scores over the whole batch tile.
        s = jnp.einsum('bqd,bkd->bqk', q, k,
                       preferred_element_type=jnp.float32)      # (B, P, P)
        s_max = jnp.max(s, axis=-1, keepdims=True)
        p = jnp.exp(s - s_max)
        denom = jnp.sum(p, axis=-1, keepdims=True)
        attn = p * pl.reciprocal(denom, approx=True)            # softmax, f32
        # attn_dropout with p=0.0 is the identity.

        o_h = jnp.einsum('bqk,bkd->bqd', attn.astype(mm_dtype), v,
                         preferred_element_type=jnp.float32)    # (B, P, hd)

        # Fused output projection for this head.
        out_acc = out_acc + jnp.dot(o_h.reshape(rows, head_dim),
                                    wo_t[lo:hi, :],
                                    preferred_element_type=jnp.float32)

    out_acc = out_acc + bo_ref[...]
    o_ref[...] = out_acc.reshape(b_tile, n_patches, c).astype(o_ref.dtype)


def multi_head_attention(x, w_qkv, b_qkv, w_out, b_out, *, num_heads: int,
                         b_tile: int | None = None, matmul_dtype=None):
    """x: (N, P, C). Weights in PyTorch Linear layout: w_qkv (3C, C), b_qkv (3C,),
    w_out (C, C), b_out (C,). Returns (N, P, C)."""
    n, p, c = x.shape
    assert c % num_heads == 0
    head_dim = c // num_heads
    scaling = float(head_dim) ** -0.5
    mm_dtype = jnp.dtype(matmul_dtype) if matmul_dtype is not None else x.dtype

    # ---- one-time wrapper-side prep (outside the grid loop) -----------------
    # Pre-transpose to (in, out) so no .T is re-executed per grid step, and
    # fold the 1/sqrt(head_dim) query scale into the Q columns of wqkv/bqkv.
    q_scale = jnp.concatenate([
        jnp.full((c,), scaling, dtype=w_qkv.dtype),
        jnp.ones((2 * c,), dtype=w_qkv.dtype)])
    w_qkv_t = w_qkv.T * q_scale[None, :]                        # (C, 3C)
    b_qkv_2d = jnp.reshape(b_qkv, (1, 3 * c)) * q_scale[None, :]
    w_out_t = w_out.T                                           # (C, C)
    b_out_2d = jnp.reshape(b_out, (1, c))

    # ---- batch tile: fill MXU M rows, amortize per-grid-step overhead -------
    # Target ~256 rows per step (>=128 fills v5e's 128-wide MXU M; 256 for
    # v6e/v7x). For larger models / v7x's smaller VMEM, re-derive b_tile and
    # keep >=2 grid steps so both v7x TensorCores get work.
    if b_tile is None:
        target_rows = 256
        b_tile = 1
        for cand in range(1, n + 1):
            if n % cand == 0 and cand * p <= max(target_rows, p):
                b_tile = cand
    assert n % b_tile == 0, "b_tile must divide the batch size"
    grid = (n // b_tile,)

    kernel = functools.partial(
        _mha_kernel, num_heads=num_heads, head_dim=head_dim,
        b_tile=b_tile, n_patches=p, matmul_dtype=mm_dtype)

    return pl.pallas_call(
        kernel,
        out_shape=jax.ShapeDtypeStruct((n, p, c), x.dtype),
        grid=grid,
        in_specs=[
            pl.BlockSpec((b_tile, p, c), lambda b: (b, 0, 0)),   # x (batch tile)
            pl.BlockSpec((c, 3 * c), lambda b: (0, 0)),          # qkv weight^T
            pl.BlockSpec((1, 3 * c), lambda b: (0, 0)),          # qkv bias
            pl.BlockSpec((c, c), lambda b: (0, 0)),              # out weight^T
            pl.BlockSpec((1, c), lambda b: (0, 0)),              # out bias
        ],
        out_specs=pl.BlockSpec((b_tile, p, c), lambda b: (b, 0, 0)),
        compiler_params=pltpu.CompilerParams(
            dimension_semantics=("parallel",)),
    )(x, w_qkv_t, b_qkv_2d, w_out_t, b_out_2d)


def _reference(x, w_qkv, b_qkv, w_out, b_out, num_heads):
    """Plain-JAX mirror of the PyTorch forward, for verification."""
    n, p, c = x.shape
    hd = c // num_heads
    qkv = jnp.einsum("npc,oc->npo", x, w_qkv) + b_qkv            # (N, P, 3C)
    qkv = qkv.reshape(n, p, 3, num_heads, hd).transpose(0, 3, 2, 1, 4)
    q, k, v = qkv[:, :, 0], qkv[:, :, 1], qkv[:, :, 2]           # (N, H, P, hd)
    q = q * (hd ** -0.5)
    attn = jax.nn.softmax(jnp.einsum("nhqd,nhkd->nhqk", q, k), axis=-1)
    out = jnp.einsum("nhqk,nhkd->nhqd", attn, v)                 # (N, H, P, hd)
    out = out.transpose(0, 2, 1, 3).reshape(n, p, c)
    return jnp.einsum("npc,oc->npo", out, w_out) + b_out


if __name__ == "__main__":
    # Small, module-consistent shapes: (N, P, C) with C % num_heads == 0.
    batch, n_patches, embed_dim, num_heads = 2, 16, 32, 4

    key = jax.random.PRNGKey(0)
    kx, k1, k2, k3, k4 = jax.random.split(key, 5)

    x = jax.random.normal(kx, (batch, n_patches, embed_dim), dtype=jnp.float32)

    # Deterministic synthetic parameters (PyTorch Linear layout: (out, in)).
    w_qkv = 0.05 * jax.random.normal(k1, (3 * embed_dim, embed_dim), dtype=jnp.float32)
    b_qkv = 0.05 * jax.random.normal(k2, (3 * embed_dim,), dtype=jnp.float32)
    w_out = 0.05 * jax.random.normal(k3, (embed_dim, embed_dim), dtype=jnp.float32)
    b_out = 0.05 * jax.random.normal(k4, (embed_dim,), dtype=jnp.float32)

    y = multi_head_attention(x, w_qkv, b_qkv, w_out, b_out, num_heads=num_heads)
    y = jax.block_until_ready(y)

    y_ref = _reference(x, w_qkv, b_qkv, w_out, b_out, num_heads)
    assert y.shape == (batch, n_patches, embed_dim)
    max_err = float(jnp.max(jnp.abs(y - y_ref)))
    # Tolerance accommodates the approx-reciprocal softmax normalization.
    assert jnp.allclose(y, y_ref, atol=2e-3, rtol=2e-3), f"mismatch vs reference (max_err={max_err})"

    print("KERNEL_OK")
</pallas_src>

<mosaic_0001>
module attributes {stable_mosaic.version = 11 : i64} {
  func.func @_mha_kernel(%arg0: i32, %arg1: memref<2x16x32xf32, #tpu.memory_space<vmem>>, %arg2: memref<32x96xf32, #tpu.memory_space<vmem>>, %arg3: memref<1x96xf32, #tpu.memory_space<vmem>>, %arg4: memref<32x32xf32, #tpu.memory_space<vmem>>, %arg5: memref<1x32xf32, #tpu.memory_space<vmem>>, %arg6: memref<2x16x32xf32, #tpu.memory_space<vmem>>) attributes {dimension_semantics = [#tpu.dimension_semantics<parallel>], iteration_bounds = array<i64: 1>, scalar_prefetch = 0 : i64, scratch_operands = 0 : i64, tpu.core_type = #tpu.core_type<tc>, window_params = [{transform_indices = @transform_0, window_bounds = array<i64: 2, 16, 32>}, {pipeline_mode = #tpu.pipeline_mode<synchronous>, transform_indices = @transform_1, window_bounds = array<i64: 32, 96>}, {pipeline_mode = #tpu.pipeline_mode<synchronous>, transform_indices = @transform_2, window_bounds = array<i64: 1, 96>}, {pipeline_mode = #tpu.pipeline_mode<synchronous>, transform_indices = @transform_3, window_bounds = array<i64: 32, 32>}, {pipeline_mode = #tpu.pipeline_mode<synchronous>, transform_indices = @transform_4, window_bounds = array<i64: 1, 32>}, {transform_indices = @transform_5, window_bounds = array<i64: 2, 16, 32>}]} {
    %c0 = arith.constant 0 : index
    %c0_0 = arith.constant 0 : index
    %c0_1 = arith.constant 0 : index
    %0 = vector.load %arg1[%c0, %c0_0, %c0_1] : memref<2x16x32xf32, #tpu.memory_space<vmem>>, vector<2x16x32xf32>
    %1 = vector.shape_cast %0 : vector<2x16x32xf32> to vector<32x32xf32>
    %c0_2 = arith.constant 0 : index
    %c0_3 = arith.constant 0 : index
    %2 = vector.load %arg2[%c0_2, %c0_3] : memref<32x96xf32, #tpu.memory_space<vmem>>, vector<32x96xf32>
    %cst = arith.constant dense<0.000000e+00> : vector<32x96xf32>
    %3 = tpu.matmul %1, %2, %cst {dimension_numbers = #tpu.dot_dimension_numbers<[1], [0], [0], [1], [0, 0, 1, 1], [], []>} : vector<32x32xf32>, vector<32x96xf32>, vector<32x96xf32> -> vector<32x96xf32>
    %c0_4 = arith.constant 0 : index
    %c0_5 = arith.constant 0 : index
    %4 = vector.load %arg3[%c0_4, %c0_5] : memref<1x96xf32, #tpu.memory_space<vmem>>, vector<1x96xf32>
    %5 = vector.broadcast %4 : vector<1x96xf32> to vector<32x96xf32>
    %6 = arith.addf %3, %5 : vector<32x96xf32>
    %7 = vector.extract_strided_slice %6 {offsets = [0, 0], sizes = [32, 32], strides = [1, 1]} : vector<32x96xf32> to vector<32x32xf32>
    %8 = vector.shape_cast %7 : vector<32x32xf32> to vector<2x16x32xf32>
    %9 = vector.extract_strided_slice %6 {offsets = [0, 32], sizes = [32, 32], strides = [1, 1]} : vector<32x96xf32> to vector<32x32xf32>
    %10 = vector.shape_cast %9 : vector<32x32xf32> to vector<2x16x32xf32>
    %11 = vector.extract_strided_slice %6 {offsets = [0, 64], sizes = [32, 32], strides = [1, 1]} : vector<32x96xf32> to vector<32x32xf32>
    %12 = vector.shape_cast %11 : vector<32x32xf32> to vector<2x16x32xf32>
    %c0_6 = arith.constant 0 : index
    %c0_7 = arith.constant 0 : index
    %13 = vector.load %arg4[%c0_6, %c0_7] : memref<32x32xf32, #tpu.memory_space<vmem>>, vector<32x32xf32>
    %cst_8 = arith.constant 0.000000e+00 : f32
    %14 = vector.broadcast %cst_8 : f32 to vector<32x32xf32>
    %15 = vector.extract_strided_slice %8 {offsets = [0, 0, 0], sizes = [2, 16, 8], strides = [1, 1, 1]} : vector<2x16x32xf32> to vector<2x16x8xf32>
    %16 = vector.extract_strided_slice %10 {offsets = [0, 0, 0], sizes = [2, 16, 8], strides = [1, 1, 1]} : vector<2x16x32xf32> to vector<2x16x8xf32>
    %17 = vector.extract_strided_slice %12 {offsets = [0, 0, 0], sizes = [2, 16, 8], strides = [1, 1, 1]} : vector<2x16x32xf32> to vector<2x16x8xf32>
    "tpu.trace_start"() <{level = 10 : i32, message = "bqd,bkd->bqk"}> : () -> ()
    %cst_9 = arith.constant dense<0.000000e+00> : vector<2x16x16xf32>
    %18 = tpu.matmul %15, %16, %cst_9 {dimension_numbers = #tpu.dot_dimension_numbers<[2], [2], [1], [1], [0, 0, 0, 1, 1, 1], [0], [0]>} : vector<2x16x8xf32>, vector<2x16x8xf32>, vector<2x16x16xf32> -> vector<2x16x16xf32>
    "tpu.trace_stop"() : () -> ()
    %cst_10 = arith.constant dense<0xFF800000> : vector<2x16xf32>
    %19 = vector.multi_reduction <maximumf>, %18, %cst_10 [2] : vector<2x16x16xf32> to vector<2x16xf32>
    %20 = vector.shape_cast %19 : vector<2x16xf32> to vector<2x16x1xf32>
    %21 = vector.broadcast %20 : vector<2x16x1xf32> to vector<2x16x16xf32>
    %22 = arith.subf %18, %21 : vector<2x16x16xf32>
    %23 = math.exp %22 : vector<2x16x16xf32>
    %cst_11 = arith.constant dense<0.000000e+00> : vector<2x16xf32>
    %24 = vector.multi_reduction <add>, %23, %cst_11 [2] : vector<2x16x16xf32> to vector<2x16xf32>
    %25 = vector.shape_cast %24 : vector<2x16xf32> to vector<2x16x1xf32>
    %26 = tpu.reciprocal %25 {approx = true} : vector<2x16x1xf32> -> vector<2x16x1xf32>
    %27 = vector.broadcast %26 : vector<2x16x1xf32> to vector<2x16x16xf32>
    %28 = arith.mulf %23, %27 : vector<2x16x16xf32>
    "tpu.trace_start"() <{level = 10 : i32, message = "bqk,bkd->bqd"}> : () -> ()
    %cst_12 = arith.constant dense<0.000000e+00> : vector<2x16x8xf32>
    %29 = tpu.matmul %28, %17, %cst_12 {dimension_numbers = #tpu.dot_dimension_numbers<[2], [1], [1], [2], [0, 0, 0, 1, 1, 2], [0], [0]>} : vector<2x16x16xf32>, vector<2x16x8xf32>, vector<2x16x8xf32> -> vector<2x16x8xf32>
    "tpu.trace_stop"() : () -> ()
    %30 = vector.shape_cast %29 : vector<2x16x8xf32> to vector<32x8xf32>
    %31 = vector.extract_strided_slice %13 {offsets = [0, 0], sizes = [8, 32], strides = [1, 1]} : vector<32x32xf32> to vector<8x32xf32>
    %cst_13 = arith.constant dense<0.000000e+00> : vector<32x32xf32>
    %32 = tpu.matmul %30, %31, %cst_13 {dimension_numbers = #tpu.dot_dimension_numbers<[1], [0], [0], [1], [0, 0, 1, 1], [], []>} : vector<32x8xf32>, vector<8x32xf32>, vector<32x32xf32> -> vector<32x32xf32>
    %33 = arith.addf %14, %32 : vector<32x32xf32>
    %34 = vector.extract_strided_slice %8 {offsets = [0, 0, 8], sizes = [2, 16, 8], strides = [1, 1, 1]} : vector<2x16x32xf32> to vector<2x16x8xf32>
    %35 = vector.extract_strided_slice %10 {offsets = [0, 0, 8], sizes = [2, 16, 8], strides = [1, 1, 1]} : vector<2x16x32xf32> to vector<2x16x8xf32>
    %36 = vector.extract_strided_slice %12 {offsets = [0, 0, 8], sizes = [2, 16, 8], strides = [1, 1, 1]} : vector<2x16x32xf32> to vector<2x16x8xf32>
    "tpu.trace_start"() <{level = 10 : i32, message = "bqd,bkd->bqk"}> : () -> ()
    %cst_14 = arith.constant dense<0.000000e+00> : vector<2x16x16xf32>
    %37 = tpu.matmul %34, %35, %cst_14 {dimension_numbers = #tpu.dot_dimension_numbers<[2], [2], [1], [1], [0, 0, 0, 1, 1, 1], [0], [0]>} : vector<2x16x8xf32>, vector<2x16x8xf32>, vector<2x16x16xf32> -> vector<2x16x16xf32>
    "tpu.trace_stop"() : () -> ()
    %cst_15 = arith.constant dense<0xFF800000> : vector<2x16xf32>
    %38 = vector.multi_reduction <maximumf>, %37, %cst_15 [2] : vector<2x16x16xf32> to vector<2x16xf32>
    %39 = vector.shape_cast %38 : vector<2x16xf32> to vector<2x16x1xf32>
    %40 = vector.broadcast %39 : vector<2x16x1xf32> to vector<2x16x16xf32>
    %41 = arith.subf %37, %40 : vector<2x16x16xf32>
    %42 = math.exp %41 : vector<2x16x16xf32>
    %cst_16 = arith.constant dense<0.000000e+00> : vector<2x16xf32>
    %43 = vector.multi_reduction <add>, %42, %cst_16 [2] : vector<2x16x16xf32> to vector<2x16xf32>
    %44 = vector.shape_cast %43 : vector<2x16xf32> to vector<2x16x1xf32>
    %45 = tpu.reciprocal %44 {approx = true} : vector<2x16x1xf32> -> vector<2x16x1xf32>
    %46 = vector.broadcast %45 : vector<2x16x1xf32> to vector<2x16x16xf32>
    %47 = arith.mulf %42, %46 : vector<2x16x16xf32>
    "tpu.trace_start"() <{level = 10 : i32, message = "bqk,bkd->bqd"}> : () -> ()
    %cst_17 = arith.constant dense<0.000000e+00> : vector<2x16x8xf32>
    %48 = tpu.matmul %47, %36, %cst_17 {dimension_numbers = #tpu.dot_dimension_numbers<[2], [1], [1], [2], [0, 0, 0, 1, 1, 2], [0], [0]>} : vector<2x16x16xf32>, vector<2x16x8xf32>, vector<2x16x8xf32> -> vector<2x16x8xf32>
    "tpu.trace_stop"() : () -> ()
    %49 = vector.shape_cast %48 : vector<2x16x8xf32> to vector<32x8xf32>
    %50 = vector.extract_strided_slice %13 {offsets = [8, 0], sizes = [8, 32], strides = [1, 1]} : vector<32x32xf32> to vector<8x32xf32>
    %cst_18 = arith.constant dense<0.000000e+00> : vector<32x32xf32>
    %51 = tpu.matmul %49, %50, %cst_18 {dimension_numbers = #tpu.dot_dimension_numbers<[1], [0], [0], [1], [0, 0, 1, 1], [], []>} : vector<32x8xf32>, vector<8x32xf32>, vector<32x32xf32> -> vector<32x32xf32>
    %52 = arith.addf %33, %51 : vector<32x32xf32>
    %53 = vector.extract_strided_slice %8 {offsets = [0, 0, 16], sizes = [2, 16, 8], strides = [1, 1, 1]} : vector<2x16x32xf32> to vector<2x16x8xf32>
    %54 = vector.extract_strided_slice %10 {offsets = [0, 0, 16], sizes = [2, 16, 8], strides = [1, 1, 1]} : vector<2x16x32xf32> to vector<2x16x8xf32>
    %55 = vector.extract_strided_slice %12 {offsets = [0, 0, 16], sizes = [2, 16, 8], strides = [1, 1, 1]} : vector<2x16x32xf32> to vector<2x16x8xf32>
    "tpu.trace_start"() <{level = 10 : i32, message = "bqd,bkd->bqk"}> : () -> ()
    %cst_19 = arith.constant dense<0.000000e+00> : vector<2x16x16xf32>
    %56 = tpu.matmul %53, %54, %cst_19 {dimension_numbers = #tpu.dot_dimension_numbers<[2], [2], [1], [1], [0, 0, 0, 1, 1, 1], [0], [0]>} : vector<2x16x8xf32>, vector<2x16x8xf32>, vector<2x16x16xf32> -> vector<2x16x16xf32>
    "tpu.trace_stop"() : () -> ()
    %cst_20 = arith.constant dense<0xFF800000> : vector<2x16xf32>
    %57 = vector.multi_reduction <maximumf>, %56, %cst_20 [2] : vector<2x16x16xf32> to vector<2x16xf32>
    %58 = vector.shape_cast %57 : vector<2x16xf32> to vector<2x16x1xf32>
    %59 = vector.broadcast %58 : vector<2x16x1xf32> to vector<2x16x16xf32>
    %60 = arith.subf %56, %59 : vector<2x16x16xf32>
    %61 = math.exp %60 : vector<2x16x16xf32>
    %cst_21 = arith.constant dense<0.000000e+00> : vector<2x16xf32>
    %62 = vector.multi_reduction <add>, %61, %cst_21 [2] : vector<2x16x16xf32> to vector<2x16xf32>
    %63 = vector.shape_cast %62 : vector<2x16xf32> to vector<2x16x1xf32>
    %64 = tpu.reciprocal %63 {approx = true} : vector<2x16x1xf32> -> vector<2x16x1xf32>
    %65 = vector.broadcast %64 : vector<2x16x1xf32> to vector<2x16x16xf32>
    %66 = arith.mulf %61, %65 : vector<2x16x16xf32>
    "tpu.trace_start"() <{level = 10 : i32, message = "bqk,bkd->bqd"}> : () -> ()
    %cst_22 = arith.constant dense<0.000000e+00> : vector<2x16x8xf32>
    %67 = tpu.matmul %66, %55, %cst_22 {dimension_numbers = #tpu.dot_dimension_numbers<[2], [1], [1], [2], [0, 0, 0, 1, 1, 2], [0], [0]>} : vector<2x16x16xf32>, vector<2x16x8xf32>, vector<2x16x8xf32> -> vector<2x16x8xf32>
    "tpu.trace_stop"() : () -> ()
    %68 = vector.shape_cast %67 : vector<2x16x8xf32> to vector<32x8xf32>
    %69 = vector.extract_strided_slice %13 {offsets = [16, 0], sizes = [8, 32], strides = [1, 1]} : vector<32x32xf32> to vector<8x32xf32>
    %cst_23 = arith.constant dense<0.000000e+00> : vector<32x32xf32>
    %70 = tpu.matmul %68, %69, %cst_23 {dimension_numbers = #tpu.dot_dimension_numbers<[1], [0], [0], [1], [0, 0, 1, 1], [], []>} : vector<32x8xf32>, vector<8x32xf32>, vector<32x32xf32> -> vector<32x32xf32>
    %71 = arith.addf %52, %70 : vector<32x32xf32>
    %72 = vector.extract_strided_slice %8 {offsets = [0, 0, 24], sizes = [2, 16, 8], strides = [1, 1, 1]} : vector<2x16x32xf32> to vector<2x16x8xf32>
    %73 = vector.extract_strided_slice %10 {offsets = [0, 0, 24], sizes = [2, 16, 8], strides = [1, 1, 1]} : vector<2x16x32xf32> to vector<2x16x8xf32>
    %74 = vector.extract_strided_slice %12 {offsets = [0, 0, 24], sizes = [2, 16, 8], strides = [1, 1, 1]} : vector<2x16x32xf32> to vector<2x16x8xf32>
    "tpu.trace_start"() <{level = 10 : i32, message = "bqd,bkd->bqk"}> : () -> ()
    %cst_24 = arith.constant dense<0.000000e+00> : vector<2x16x16xf32>
    %75 = tpu.matmul %72, %73, %cst_24 {dimension_numbers = #tpu.dot_dimension_numbers<[2], [2], [1], [1], [0, 0, 0, 1, 1, 1], [0], [0]>} : vector<2x16x8xf32>, vector<2x16x8xf32>, vector<2x16x16xf32> -> vector<2x16x16xf32>
    "tpu.trace_stop"() : () -> ()
    %cst_25 = arith.constant dense<0xFF800000> : vector<2x16xf32>
    %76 = vector.multi_reduction <maximumf>, %75, %cst_25 [2] : vector<2x16x16xf32> to vector<2x16xf32>
    %77 = vector.shape_cast %76 : vector<2x16xf32> to vector<2x16x1xf32>
    %78 = vector.broadcast %77 : vector<2x16x1xf32> to vector<2x16x16xf32>
    %79 = arith.subf %75, %78 : vector<2x16x16xf32>
    %80 = math.exp %79 : vector<2x16x16xf32>
    %cst_26 = arith.constant dense<0.000000e+00> : vector<2x16xf32>
    %81 = vector.multi_reduction <add>, %80, %cst_26 [2] : vector<2x16x16xf32> to vector<2x16xf32>
    %82 = vector.shape_cast %81 : vector<2x16xf32> to vector<2x16x1xf32>
    %83 = tpu.reciprocal %82 {approx = true} : vector<2x16x1xf32> -> vector<2x16x1xf32>
    %84 = vector.broadcast %83 : vector<2x16x1xf32> to vector<2x16x16xf32>
    %85 = arith.mulf %80, %84 : vector<2x16x16xf32>
    "tpu.trace_start"() <{level = 10 : i32, message = "bqk,bkd->bqd"}> : () -> ()
    %cst_27 = arith.constant dense<0.000000e+00> : vector<2x16x8xf32>
    %86 = tpu.matmul %85, %74, %cst_27 {dimension_numbers = #tpu.dot_dimension_numbers<[2], [1], [1], [2], [0, 0, 0, 1, 1, 2], [0], [0]>} : vector<2x16x16xf32>, vector<2x16x8xf32>, vector<2x16x8xf32> -> vector<2x16x8xf32>
    "tpu.trace_stop"() : () -> ()
    %87 = vector.shape_cast %86 : vector<2x16x8xf32> to vector<32x8xf32>
    %88 = vector.extract_strided_slice %13 {offsets = [24, 0], sizes = [8, 32], strides = [1, 1]} : vector<32x32xf32> to vector<8x32xf32>
    %cst_28 = arith.constant dense<0.000000e+00> : vector<32x32xf32>
    %89 = tpu.matmul %87, %88, %cst_28 {dimension_numbers = #tpu.dot_dimension_numbers<[1], [0], [0], [1], [0, 0, 1, 1], [], []>} : vector<32x8xf32>, vector<8x32xf32>, vector<32x32xf32> -> vector<32x32xf32>
    %90 = arith.addf %71, %89 : vector<32x32xf32>
    %c0_29 = arith.constant 0 : index
    %c0_30 = arith.constant 0 : index
    %91 = vector.load %arg5[%c0_29, %c0_30] : memref<1x32xf32, #tpu.memory_space<vmem>>, vector<1x32xf32>
    %92 = vector.broadcast %91 : vector<1x32xf32> to vector<32x32xf32>
    %93 = arith.addf %90, %92 : vector<32x32xf32>
    %94 = vector.shape_cast %93 : vector<32x32xf32> to vector<2x16x32xf32>
    %c0_31 = arith.constant 0 : index
    %c0_32 = arith.constant 0 : index
    %c0_33 = arith.constant 0 : index
    %95 = vector.load %arg6[%c0_31, %c0_32, %c0_33] : memref<2x16x32xf32, #tpu.memory_space<vmem>>, vector<2x16x32xf32>
    tpu.vector_store %arg6[%c0_31, %c0_32, %c0_33], %94 {strides = array<i32>} : memref<2x16x32xf32, #tpu.memory_space<vmem>>, vector<2x16x32xf32>,
    return
  }
  func.func @transform_0(%arg0: i32) -> (i32, i32, i32) {
    %c0_i32 = arith.constant 0 : i32
    %c0_i32_0 = arith.constant 0 : i32
    %c0_i32_1 = arith.constant 0 : i32
    return %arg0, %c0_i32, %c0_i32_0 : i32, i32, i32
  }
  func.func @transform_1(%arg0: i32) -> (i32, i32) {
    %c0_i32 = arith.constant 0 : i32
    %c0_i32_0 = arith.constant 0 : i32
    %c0_i32_1 = arith.constant 0 : i32
    return %c0_i32, %c0_i32_0 : i32, i32
  }
  func.func @transform_2(%arg0: i32) -> (i32, i32) {
    %c0_i32 = arith.constant 0 : i32
    %c0_i32_0 = arith.constant 0 : i32
    %c0_i32_1 = arith.constant 0 : i32
    return %c0_i32, %c0_i32_0 : i32, i32
  }
  func.func @transform_3(%arg0: i32) -> (i32, i32) {
    %c0_i32 = arith.constant 0 : i32
    %c0_i32_0 = arith.constant 0 : i32
    %c0_i32_1 = arith.constant 0 : i32
    return %c0_i32, %c0_i32_0 : i32, i32
  }
  func.func @transform_4(%arg0: i32) -> (i32, i32) {
    %c0_i32 = arith.constant 0 : i32
    %c0_i32_0 = arith.constant 0 : i32
    %c0_i32_1 = arith.constant 0 : i32
    return %c0_i32, %c0_i32_0 : i32, i32
  }
  func.func @transform_5(%arg0: i32) -> (i32, i32, i32) {
    %c0_i32 = arith.constant 0 : i32
    %c0_i32_0 = arith.constant 0 : i32
    %c0_i32_1 = arith.constant 0 : i32
    return %arg0, %c0_i32, %c0_i32_0 : i32, i32, i32
  }
}

</mosaic_0001>

<bundles_post_ra>
// kernel: tpu_custom_call.1
= control target key start
LH: loop header
LB: loop body
LE: loop exit
PB: predicated region body
PF: predicated region fallthrough
CT: control target
= control target key end

     0   :  { %10 = vsyncpa [#allocation3], 0  ;;  %s3010_s0 = inlined_call_operand.hbm [shape: f32[2,16,32], index: 0, kind: input, shape index: {}]   ;;  %s3011_s1 = inlined_call_operand.hbm [shape: f32[32,96], index: 1, kind: input, shape index: {}]   ;;  %s3012_s2 = inlined_call_operand.vmem [shape: f32[1,96], index: 2, kind: input, shape index: {}]   ;;  %s3013_s3 = inlined_call_operand.hbm [shape: f32[32,32], index: 3, kind: input, shape index: {}]   ;;  %s3014_s4 = inlined_call_operand.vmem [shape: f32[1,32], index: 4, kind: input, shape index: {}]   ;;  %s3015_s5 = inlined_call_operand.hbm [shape: f32[2,16,32], index: 5, kind: output, shape index: {}]  }
   0x1   :  { %11 = vsyncpa [#allocation6], 0 }
   0x2   :  { %12 = vsyncpa [#allocation4], 0  ;;  %s2693_s18 = smov [#allocation5]   ;;  %s2694_s20 = smov [#allocation2]  }
   0x3   :  { %s30_s19 = sshll.u32 %s2693_s18, 4  ;;  %s18_s21 = sshll.u32 %s2694_s20, 4  ;;  %s31_s19 = int_to_ptr.vmem [resolvable:$true] %s30_s19  ;;  %s19_s21 = int_to_ptr.vmem [resolvable:$true] %s18_s21 }
   0x4   :  { %s2615_s22 = scalar_lea.vmem %s31_s19, 512  ;;  %p2620_p1 = scmp.lt.s32.totalorder %s31_s19, %s31_s19 }
   0x5   :  { %p2616_p0 = scmp.ne.s32.totalorder %s31_s19, %s2615_s22  ;;  %p2621_p2 = scmp.lt.s32.totalorder %s2615_s22, %s2615_s22 }
   0x7   :  { %p2622_p3 = por %p2621_p2, %p2620_p1 }
   0x9   :  { %p2623_p4 = pnand %p2622_p3, %p2616_p0 }
   0xb   :  { %2626 = shalt.err (!%p2623_p4)
}
   0xc   :  { %s2695_s23 = smov 128   ;;  %s2696_s24 = smov 8  }
   0xd   :  { %36 = dma.hbm_to_vmem [thread:$0]  %s3011_s1, 512, %s31_s19, [#allocation6], %s2695_s23, %s2695_s23, %s2696_s24  }
   0xe   :  { %s2635_s27 = scalar_lea.vmem %s19_s21, 512  ;;  %p2640_p6 = scmp.lt.s32.totalorder %s19_s21, %s19_s21 }
   0xf   :  { %p2636_p5 = scmp.ne.s32.totalorder %s19_s21, %s2635_s27  ;;  %p2641_p7 = scmp.lt.s32.totalorder %s2635_s27, %s2635_s27 }
  0x11   :  { %p2642_p8 = por %p2641_p7, %p2640_p6 }
  0x13   :  { %p2643_p9 = pnand %p2642_p8, %p2636_p5 }
  0x15   :  { %2646 = shalt.err (!%p2643_p9)
}
  0x16   :  { %24 = dma.hbm_to_vmem [thread:$0]  %s3010_s0, 512, %s19_s21, [#allocation3], %s2695_s23, %s2695_s23, %s2696_s24  }
  0x17   :  { %s2697_s30 = smov [#allocation7]  }
  0x18   :  { %s44_s6 = sshll.u32 %s2697_s30, 4  ;;  %s45_s6 = int_to_ptr.vmem [resolvable:$true] %s44_s6 }
  0x19   :  { %s2655_s7 = scalar_lea.vmem %s45_s6, 512  ;;  %p2660_p11 = scmp.lt.s32.totalorder %s45_s6, %s45_s6 }
  0x1a   :  { %p2656_p10 = scmp.ne.s32.totalorder %s45_s6, %s2655_s7  ;;  %p2661_p12 = scmp.lt.s32.totalorder %s2655_s7, %s2655_s7 }
  0x1c   :  { %p2662_p13 = por %p2661_p12, %p2660_p11 }
  0x1e   :  { %p2663_p0 = pnand %p2662_p13, %p2656_p10 }
  0x20   :  { %2666 = shalt.err (!%p2663_p0)
}
  0x21   :  { %50 = dma.hbm_to_vmem [thread:$0]  %s3013_s3, 512, %s45_s6, [#allocation6], %s2695_s23, %s2695_s23, %s2696_s24  }
  0x22   :  { %2687 = dma.done.wait [#allocation3], 512  }
  0x23   :  { %2688 = vsyncadd [#allocation3], 4294966784 }
  0x24   :  { %2689 = dma.done.wait [#allocation6], 1024  }
  0x25   :  { %2690 = vsyncadd [#allocation6], 4294966272  ;;  %vm77_vm0 = vcmask 261120   ;;  %v69_v0 = vld [vmem:[#allocation5 + $0x18] sm:$0xff]  ;;  %v68_v1 = vld [vmem:[#allocation5 + $0x10] sm:$0xff]  ;;  %vm185_vm1 = vcmask 64512  }
  0x26   :  { %2368 = vmatprep.subr.mxu0 %v69_v0  ;;  %v62_v2 = vld [vmem:[#allocation2] sm:$0xff]  ;;  %v67_v3 = vld [vmem:[#allocation5 + $0x8] sm:$0xff]  ;;  %v64_v6 = vld [vmem:[#allocation2 + $0x10] sm:$0xff]  ;;  %s2698_s9 = smov 96   ;;  %vm358_vm2 = vcmask 130048   ;;  %s2700_s10 = smov 88  }
  0x27   :  { %2369 = vmatpush3.msra.mxu0 %v69_v0  ;;  %2376 = vmatprep.mubr.msk.f32.mxu0 %vm77_vm0, %v62_v2  ;;  %v66_v4 = vld [vmem:[#allocation5] sm:$0xff]  ;;  %v63_v5 = vld [vmem:[#allocation2 + $0x8] sm:$0xff]  ;;  %v65_v7 = vld [vmem:[#allocation2 + $0x18] sm:$0xff]  ;;  %s2701_s11 = smov 120   ;;  %s2702_s12 = smov 56  }
  0x28   :  { %2370 = vmatprep.subr.mxu0 %v68_v1  ;;  %v2206_v8 = vld [vmem:[%s3012_s2] ss:$0 sm:$0xff]  ;;  %s2699_s2 = smov 64   ;;  %s2703_s13 = smov 80  }
  0x29   :  { %2371 = vmatpush3.msra.mxu0 %v68_v1  ;;  %s2704_s14 = smov 112   ;;  %s2705_s15 = smov 48  }
  0x2a   :  { %2372 = vmatprep.subr.mxu0 %v67_v3  ;;  %s2706_s16 = smov 72   ;;  %s2707_s17 = smov 104  }
  0x2b   :  { %2373 = vmatpush3.msra.mxu0 %v67_v3  ;;  %s2708_s18 = smov 40   ;;  %s2709_s21 = smov [#allocation8]  }
  0x2c   :  { %2374 = vmatprep.subr.mxu0 %v66_v4  ;;  %s2193_s22 = sshll.u32 %s2709_s21, 4  ;;  %s2194_s22 = int_to_ptr.vmem [resolvable:$true] %s2193_s22 }
  0x2d   :  { %2375 = vmatpush3.msra.mxu0 %v66_v4  ;;  %p2672_p2 = scmp.lt.s32.totalorder %s2194_s22, %s2194_s22 }
  0x2e   :  { %2377 = vmatmul.mubr.msk.f32.vlgmr.msra.gmra.mxu0 %vm77_vm0, %v63_v5 }
  0x2f   :  { %2379 = vmatprep.mubr.msk.f32.mxu0 %vm77_vm0, %v64_v6 }
  0x32   :  { %2380 = vmatmul.mubr.msk.f32.gmra.mxu0 %vm77_vm0, %v65_v7 }
  0xee   :  { %v2378_v9 = vpop.f32.mrf.mxu0 }
  0xef   :  { %v2765_v10 = vadd.f32 %v2378_v9, %v2206_v8 }
  0xf0   :  { %v156_v11 = vpop.f32.mrf.mxu0 }
  0xf1   :  { %v2767_v12 = vadd.f32 %v2206_v8, %v156_v11  ;;  %183 = vrot.lane.b32.xlu0 %v2765_v10, %s2698_s9 }
  0xf2   :  { %v2381_v13 = vpop.f32.mrf.mxu0 }
  0xf3   :  { %v2770_v14 = vadd.f32 %v2381_v13, %v2206_v8  ;;  %2386 = vmatprep.mubr.msk.f32.mxu1 %vm185_vm1, %v2767_v12 }
  0xf4   :  { %v166_v15 = vpop.f32.mrf.mxu0 }
  0xf5   :  { %273 = vrot.lane.b32.xlu1 %v2770_v14, %s2698_s9  ;;  %181 = vrot.lane.b32.xlu0 %v2767_v12, %s2698_s9  ;;  %v2776_v16 = vadd.f32 %v2206_v8, %v166_v15 }
  0xf7   :  { %2393 = vmatprep.mubr.msk.f32.mxu0 %vm185_vm1, %v2776_v16 }
  0xf9   :  { %271 = vrot.lane.b32.xlu1 %v2776_v16, %s2698_s9 }
 0x163   :  { %v184_v17 = vpop.permute.xlu0 %183 }
 0x164   :  { %2382 = vmatprep.subr.msk.mxu1 %vm185_vm1, %v184_v17 }
 0x165   :  { %2383 = vmatpush3.xpose.msk.msra.mxu1 %vm185_vm1, %v184_v17 }
 0x167   :  { %v274_v18 = vpop.permute.xlu1 %273  ;;  %v182_v19 = vpop.permute.xlu0 %181 }
 0x168   :  { %2384 = vmatprep.subr.msk.mxu1 %vm185_vm1, %v182_v19  ;;  %2389 = vmatprep.subr.msk.mxu0 %vm185_vm1, %v274_v18 }
 0x169   :  { %2385 = vmatpush3.xpose.msk.msra.mxu1 %vm185_vm1, %v182_v19  ;;  %2390 = vmatpush3.xpose.msk.msra.mxu0 %vm185_vm1, %v274_v18 }
 0x16b   :  { %v272_v20 = vpop.permute.xlu1 %271 }
 0x16c   :  { %2387 = vmatmul.mubr.msk.f32.vlgmr.msra.gmra.mxu1 %vm185_vm1, %v2765_v10  ;;  %2391 = vmatprep.subr.msk.mxu0 %vm185_vm1, %v272_v20 }
 0x16d   :  { %2392 = vmatpush3.xpose.msk.msra.mxu0 %vm185_vm1, %v272_v20 }
 0x170   :  { %2394 = vmatmul.mubr.msk.f32.vlgmr.msra.gmra.mxu0 %vm185_vm1, %v2770_v14 }
 0x22c   :  { %v2388_v21 = vpop.f32.mrf.mxu1 }
 0x22d   :  { %v362_v22 = vsel %vm358_vm2, %v2388_v21, -inf }
 0x22e   :  { %363 = vmax.xlane.f32.xlu1 %v362_v22  ;;  %v260_v23 = vpop.f32.mrf.mxu1 }
 0x22f   :  { %v359_v24 = vsel %vm358_vm2, %v260_v23, -inf }
 0x230   :  { %v2395_v25 = vpop.f32.mrf.mxu0  ;;  %360 = vmax.xlane.f32.xlu0 %v359_v24 }
 0x231   :  { %v368_v28 = vsel %vm358_vm2, %v2395_v25, -inf }
 0x232   :  { %v349_v26 = vpop.f32.mrf.mxu0 }
 0x233   :  { %v365_v27 = vsel %vm358_vm2, %v349_v26, -inf }
 0x234   :  { %366 = vmax.xlane.f32.xlu0 %v365_v27 }
 0x238   :  { %369 = vmax.xlane.f32.xlu0 %v368_v28 }
 0x23f   :  { %405 = vrot.lane.b32.xlu1 %v2765_v10, %s2699_s2 }
 0x243   :  { %492 = vrot.lane.b32.xlu1 %v2770_v14, %s2699_s2 }
 0x247   :  { %583 = vrot.lane.b32.xlu1 %v2765_v10, %s2700_s10 }
 0x24b   :  { %581 = vrot.lane.b32.xlu1 %v2767_v12, %s2700_s10 }
 0x24e   :  { %403 = vrot.lane.b32.xlu0 %v2767_v12, %s2699_s2 }
 0x24f   :  { %577 = vrot.lane.b32.xlu1 %v2767_v12, %s2701_s11 }
 0x252   :  { %490 = vrot.lane.b32.xlu0 %v2776_v16, %s2699_s2 }
 0x256   :  { %674 = vrot.lane.b32.xlu0 %v2770_v14, %s2700_s10 }
 0x2b7   :  { %v364_v29 = vpop.xlane.xlu1 %363 }
 0x2b8   :  { %v372_v30 = vsub.f32 %v2388_v21, %v364_v29 }
 0x2b9   :  { %v361_v31 = vpop.xlane.xlu0 %360 }
 0x2ba   :  { %v377_v32 = vmul.f32 1.442695, %v372_v30  ;;  %v371_v33 = vsub.f32 %v260_v23, %v361_v31 }
 0x2bb   :  { %v406_v34 = vpop.permute.xlu1 %405 }
 0x2bc   :  { %2543 = vpow2.f32 %v377_v32  ;;  %v375_v35 = vmul.f32 1.442695, %v371_v33  ;;  %2396 = vmatprep.subr.mxu1 %v406_v34 }
 0x2bd   :  { %2397 = vmatpush3.msra.mxu1 %v406_v34  ;;  %v367_v36 = vpop.xlane.xlu0 %366 }
 0x2be   :  { %2545 = vpow2.f32 %v375_v35  ;;  %v373_v51 = vsub.f32 %v349_v26, %v367_v36 }
 0x2bf   :  { %v493_v37 = vpop.permute.xlu1 %492 }
 0x2c0   :  { %v379_v52 = vmul.f32 1.442695, %v373_v51 }
 0x2c1   :  { %v370_v38 = vpop.xlane.xlu0 %369 }
 0x2c2   :  { %v374_v39 = vsub.f32 %v2395_v25, %v370_v38 }
 0x2c3   :  { %v584_v40 = vpop.permute.xlu1 %583 }
 0x2c4   :  { %v381_v41 = vmul.f32 1.442695, %v374_v39  ;;  %2410 = vmatprep.subr.msk.mxu0 %vm185_vm1, %v584_v40 }
 0x2c5   :  { %2411 = vmatpush3.xpose.msk.msra.mxu0 %vm185_vm1, %v584_v40  ;;  %v404_v42 = vpop.permute.xlu0 %403 }
 0x2c6   :  { %2547 = vpow2.f32 %v381_v41  ;;  %2398 = vmatprep.subr.mxu1 %v404_v42 }
 0x2c7   :  { %v582_v43 = vpop.permute.xlu1 %581  ;;  %2399 = vmatpush3.msra.mxu1 %v404_v42  ;;  %2549 = vpow2.f32 %v379_v52 }
 0x2c8   :  { %2403 = vmatprep.subr.mxu1 %v493_v37  ;;  %2412 = vmatprep.subr.msk.mxu0 %vm185_vm1, %v582_v43 }
 0x2c9   :  { %v2544_v44 = vpop.eup %2543  ;;  %2413 = vmatpush3.xpose.msk.msra.mxu0 %vm185_vm1, %v582_v43  ;;  %v491_v55 = vpop.permute.xlu0 %490 }
 0x2ca   :  { %v386_v45 = vsel %vm358_vm2, %v2544_v44, 0.0 }
 0x2cb   :  { %v2546_v46 = vpop.eup %2545  ;;  %v578_v47 = vpop.permute.xlu1 %577  ;;  %387 = vadd.xlane.f32.xlu0 %v386_v45 }
 0x2cc   :  { %2414 = vmatprep.mubr.msk.f32.mxu0 %vm185_vm1, %v578_v47  ;;  %v383_v48 = vsel %vm358_vm2, %v2546_v46, 0.0 }
 0x2cd   :  { %384 = vadd.xlane.f32.xlu1 %v383_v48  ;;  %v675_v56 = vpop.permute.xlu0 %674 }
 0x2d3   :  { %v2548_v49 = vpop.eup %2547 }
 0x2d4   :  { %v392_v50 = vsel %vm358_vm2, %v2548_v49, 0.0  ;;  %v2550_v53 = vpop.eup %2549 }
 0x2d5   :  { %393 = vadd.xlane.f32.xlu0 %v392_v50  ;;  %v389_v54 = vsel %vm358_vm2, %v2550_v53, 0.0 }
 0x2de   :  { %672 = vrot.lane.b32.xlu1 %v2776_v16, %s2700_s10 }
 0x2eb   :  { %579 = vrot.lane.b32.xlu0 %v2765_v10, %s2701_s11 }
 0x2ef   :  { %668 = vrot.lane.b32.xlu0 %v2776_v16, %s2701_s11 }
 0x302   :  { %390 = vadd.xlane.f32.xlu1 %v389_v54  ;;  %v175_v54 = vld [vmem:[#allocation7] sm:$0xff] }
 0x313   :  { %670 = vrot.lane.b32.xlu1 %v2770_v14, %s2701_s11 }
 0x354   :  { %v388_v57 = vpop.xlane.xlu0 %387 }
 0x355   :  { %2551 = vrcp.f32 %v388_v57  ;;  %v176_v57 = vld [vmem:[#allocation7 + $0x8] sm:$0xff] }
 0x356   :  { %v385_v58 = vpop.xlane.xlu1 %384 }
 0x357   :  { %2553 = vrcp.f32 %v385_v58 }
 0x35a   :  { %v673_v1 = vpop.permute.xlu1 %672 }
 0x35e   :  { %v394_v59 = vpop.xlane.xlu0 %393 }
 0x35f   :  { %2555 = vrcp.f32 %v394_v59 }
 0x362   :  { %v580_v60 = vpop.permute.xlu0 %579  ;;  %v2552_v61 = vpop.eup %2551 }
 0x363   :  { %2415 = vmatmul.mubr.msk.f32.vlgmr.msra.gmra.mxu0 %vm185_vm1, %v580_v60  ;;  %v400_v0 = vmul.f32 %v2552_v61, %v2544_v44 }
 0x364   :  { %v2554_v62 = vpop.eup %2553 }
 0x365   :  { %v399_v63 = vmul.f32 %v2554_v62, %v2546_v46 }
 0x366   :  { %v669_v7 = vpop.permute.xlu0 %668 }
 0x367   :  { %2400 = vmatprep.mubr.msk.f32.mxu1 %vm358_vm2, %v399_v63 }
 0x368   :  { %2401 = vmatmul.mubr.msk.f32.vlgmr.msra.gmra.mxu1 %vm358_vm2, %v400_v0 }
 0x369   :  { %2404 = vmatpush3.msra.mxu1 %v493_v37 }
 0x36a   :  { %2405 = vmatprep.subr.mxu1 %v491_v55 }
 0x36b   :  { %2406 = vmatpush3.msra.mxu1 %v491_v55 }
 0x36c   :  { %2417 = vmatprep.subr.msk.mxu1 %vm185_vm1, %v675_v56  ;;  %v2556_v3 = vpop.eup %2555 }
 0x36d   :  { %v402_v6 = vmul.f32 %v2556_v3, %v2548_v49 }
 0x38b   :  { %v391_v2 = vpop.xlane.xlu1 %390 }
 0x38c   :  { %2557 = vrcp.f32 %v391_v2 }
 0x38f   :  { %v671_v8 = vpop.permute.xlu1 %670 }
 0x399   :  { %v2558_v4 = vpop.eup %2557 }
 0x39a   :  { %v401_v5 = vmul.f32 %v2558_v4, %v2550_v53 }
 0x39c   :  { %2407 = vmatprep.mubr.msk.f32.mxu1 %vm358_vm2, %v401_v5 }
 0x39d   :  { %2408 = vmatmul.mubr.msk.f32.vlgmr.msra.gmra.mxu1 %vm358_vm2, %v402_v6 }
 0x39e   :  { %2418 = vmatpush3.xpose.msk.msra.mxu1 %vm185_vm1, %v675_v56  ;;  %2421 = vmatprep.mubr.msk.f32.mxu1 %vm185_vm1, %v669_v7 }
 0x39f   :  { %2419 = vmatprep.subr.msk.mxu1 %vm185_vm1, %v673_v1 }
 0x3a2   :  { %2420 = vmatpush3.xpose.msk.msra.mxu1 %vm185_vm1, %v673_v1 }
 0x3a5   :  { %2422 = vmatmul.mubr.msk.f32.vlgmr.msra.gmra.mxu1 %vm185_vm1, %v671_v8 }
 0x423   :  { %v2416_v9 = vpop.f32.mrf.mxu0 }
 0x424   :  { %v762_v11 = vsel %vm358_vm2, %v2416_v9, -inf }
 0x425   :  { %763 = vmax.xlane.f32.xlu1 %v762_v11  ;;  %v659_v13 = vpop.f32.mrf.mxu0 }
 0x426   :  { %v759_v15 = vsel %vm358_vm2, %v659_v13, -inf }
 0x427   :  { %760 = vmax.xlane.f32.xlu0 %v759_v15 }
 0x428   :  { %v2839_v17 = vpop.f32.mrf.mxu1 }
 0x42a   :  { %v2841_v18 = vpop.f32.mrf.mxu1 }
 0x45d   :  { %v2843_v19 = vpop.f32.mrf.mxu1 }
 0x45f   :  { %v2845_v20 = vpop.f32.mrf.mxu1 }
 0x465   :  { %v2423_v21 = vpop.f32.mrf.mxu1 }
 0x466   :  { %v768_v24 = vsel %vm358_vm2, %v2423_v21, -inf }
 0x467   :  { %v750_v22 = vpop.f32.mrf.mxu1 }
 0x468   :  { %v765_v23 = vsel %vm358_vm2, %v750_v22, -inf }
 0x469   :  { %766 = vmax.xlane.f32.xlu0 %v765_v23 }
 0x46d   :  { %769 = vmax.xlane.f32.xlu0 %v768_v24 }
 0x4ae   :  { %v764_v25 = vpop.xlane.xlu1 %763 }
 0x4af   :  { %v772_v26 = vsub.f32 %v2416_v9, %v764_v25 }
 0x4b0   :  { %v761_v27 = vpop.xlane.xlu0 %760 }
 0x4b1   :  { %v777_v28 = vmul.f32 1.442695, %v772_v26  ;;  %v771_v29 = vsub.f32 %v659_v13, %v761_v27 }
 0x4b3   :  { %2559 = vpow2.f32 %v777_v28  ;;  %v775_v30 = vmul.f32 1.442695, %v771_v29 }
 0x4b5   :  { %2561 = vpow2.f32 %v775_v30 }
 0x4c0   :  { %v2560_v31 = vpop.eup %2559 }
 0x4c1   :  { %v786_v32 = vsel %vm358_vm2, %v2560_v31, 0.0 }
 0x4c2   :  { %v2562_v33 = vpop.eup %2561  ;;  %787 = vadd.xlane.f32.xlu0 %v786_v32 }
 0x4c3   :  { %v783_v34 = vsel %vm358_vm2, %v2562_v33, 0.0 }
 0x4c4   :  { %784 = vadd.xlane.f32.xlu1 %v783_v34 }
 0x4d5   :  { %805 = vrot.lane.b32.xlu1 %v2765_v10, %s2702_s12 }
 0x4d9   :  { %892 = vrot.lane.b32.xlu1 %v2770_v14, %s2702_s12 }
 0x4f2   :  { %v767_v35 = vpop.xlane.xlu0 %766 }
 0x4f3   :  { %v773_v36 = vsub.f32 %v750_v22, %v767_v35 }
 0x4f5   :  { %v779_v37 = vmul.f32 1.442695, %v773_v36 }
 0x4f6   :  { %v770_v38 = vpop.xlane.xlu0 %769 }
 0x4f7   :  { %2563 = vpow2.f32 %v779_v37  ;;  %v774_v39 = vsub.f32 %v2423_v21, %v770_v38 }
 0x4f9   :  { %v781_v40 = vmul.f32 1.442695, %v774_v39 }
 0x4fb   :  { %2565 = vpow2.f32 %v781_v40 }
 0x504   :  { %v2564_v41 = vpop.eup %2563 }
 0x505   :  { %v789_v42 = vsel %vm358_vm2, %v2564_v41, 0.0 }
 0x506   :  { %790 = vadd.xlane.f32.xlu1 %v789_v42 }
 0x508   :  { %v2566_v43 = vpop.eup %2565 }
 0x509   :  { %v792_v44 = vsel %vm358_vm2, %v2566_v43, 0.0 }
 0x50a   :  { %793 = vadd.xlane.f32.xlu0 %v792_v44 }
 0x517   :  { %890 = vrot.lane.b32.xlu1 %v2776_v16, %s2702_s12 }
 0x51b   :  { %1175 = vrot.lane.b32.xlu1 %v2767_v12, %s2703_s13 }
 0x51f   :  { %1171 = vrot.lane.b32.xlu1 %v2767_v12, %s2704_s14 }
 0x520   :  { %803 = vrot.lane.b32.xlu0 %v2767_v12, %s2702_s12 }
 0x523   :  { %1266 = vrot.lane.b32.xlu1 %v2776_v16, %s2703_s13 }
 0x524   :  { %1177 = vrot.lane.b32.xlu0 %v2765_v10, %s2703_s13 }
 0x527   :  { %1264 = vrot.lane.b32.xlu1 %v2770_v14, %s2704_s14 }
 0x528   :  { %1268 = vrot.lane.b32.xlu0 %v2770_v14, %s2703_s13 }
 0x52c   :  { %1173 = vrot.lane.b32.xlu0 %v2765_v10, %s2704_s14 }
 0x530   :  { %1262 = vrot.lane.b32.xlu0 %v2776_v16, %s2704_s14 }
 0x54b   :  { %v788_v50 = vpop.xlane.xlu0 %787 }
 0x54d   :  { %v785_v45 = vpop.xlane.xlu1 %784 }
 0x54e   :  { %2567 = vrcp.f32 %v785_v45 }
 0x54f   :  { %2569 = vrcp.f32 %v788_v50 }
 0x551   :  { %v806_v46 = vpop.permute.xlu1 %805 }
 0x552   :  { %2424 = vmatprep.subr.mxu0 %v806_v46 }
 0x553   :  { %2425 = vmatpush3.msra.mxu0 %v806_v46 }
 0x555   :  { %v893_v47 = vpop.permute.xlu1 %892 }
 0x556   :  { %2431 = vmatprep.subr.mxu1 %v893_v47 }
 0x557   :  { %2432 = vmatpush3.msra.mxu1 %v893_v47 }
 0x55b   :  { %v2568_v48 = vpop.eup %2567 }
 0x55c   :  { %v799_v49 = vmul.f32 %v2568_v48, %v2562_v33  ;;  %v2570_v55 = vpop.eup %2569 }
 0x55d   :  { %v800_v58 = vmul.f32 %v2570_v55, %v2560_v31 }
 0x55e   :  { %2428 = vmatprep.mubr.msk.f32.mxu0 %vm358_vm2, %v799_v49 }
 0x58f   :  { %v791_v51 = vpop.xlane.xlu1 %790 }
 0x590   :  { %2571 = vrcp.f32 %v791_v51 }
 0x593   :  { %v891_v52 = vpop.permute.xlu1 %890  ;;  %v794_v53 = vpop.xlane.xlu0 %793 }
 0x594   :  { %2573 = vrcp.f32 %v794_v53  ;;  %2433 = vmatprep.subr.mxu1 %v891_v52 }
 0x595   :  { %2434 = vmatpush3.msra.mxu1 %v891_v52 }
 0x596   :  { %2446 = vmatprep.subr.mxu1 %v175_v54 }
 0x597   :  { %v804_v56 = vpop.permute.xlu0 %803  ;;  %v1176_v61 = vpop.permute.xlu1 %1175 }
 0x598   :  { %2426 = vmatprep.subr.mxu0 %v804_v56 }
 0x599   :  { %2427 = vmatpush3.msra.mxu0 %v804_v56 }
 0x59a   :  { %2429 = vmatmul.mubr.msk.f32.vlgmr.msra.gmra.mxu0 %vm358_vm2, %v800_v58  ;;  %2438 = vmatprep.subr.mxu0 %v176_v57 }
 0x59b   :  { %2439 = vmatpush3.msra.mxu0 %v176_v57  ;;  %v1178_v59 = vpop.permute.xlu0 %1177  ;;  %v1172_v2 = vpop.permute.xlu1 %1171  ;;  %v177_v57 = vld [vmem:[#allocation7 + $0x10] sm:$0xff] }
 0x59c   :  { %2454 = vmatprep.subr.msk.mxu0 %vm185_vm1, %v1178_v59 }
 0x59d   :  { %v2572_v60 = vpop.eup %2571 }
 0x59e   :  { %v801_v62 = vmul.f32 %v2572_v60, %v2564_v41 }
 0x59f   :  { %v1269_v63 = vpop.permute.xlu0 %1268  ;;  %v1267_v4 = vpop.permute.xlu1 %1266 }
 0x5a0   :  { %2435 = vmatprep.mubr.msk.f32.mxu1 %vm358_vm2, %v801_v62 }
 0x5a1   :  { %v2574_v0 = vpop.eup %2573 }
 0x5a2   :  { %v802_v1 = vmul.f32 %v2574_v0, %v2566_v43 }
 0x5a3   :  { %v1174_v3 = vpop.permute.xlu0 %1173  ;;  %v1265_v6 = vpop.permute.xlu1 %1264 }
 0x5a4   :  { %2436 = vmatmul.mubr.msk.f32.vlgmr.msra.gmra.mxu1 %vm358_vm2, %v802_v1 }
 0x5a5   :  { %2447 = vmatpush3.msra.mxu1 %v175_v54  ;;  %2448 = vmatprep.mubr.msk.f32.mxu1 %vm185_vm1, %v2841_v18 }
 0x5a6   :  { %2461 = vmatprep.subr.msk.mxu1 %vm185_vm1, %v1269_v63 }
 0x5a7   :  { %v1263_v5 = vpop.permute.xlu0 %1262 }
 0x5a8   :  { %2449 = vmatmul.mubr.msk.f32.vlgmr.msra.gmra.mxu1 %vm185_vm1, %v2839_v17 }
 0x5a9   :  { %2462 = vmatpush3.xpose.msk.msra.mxu1 %vm185_vm1, %v1269_v63  ;;  %2451 = vmatprep.mubr.msk.f32.mxu1 %vm185_vm1, %v2845_v20 }
 0x5aa   :  { %2463 = vmatprep.subr.msk.mxu1 %vm185_vm1, %v1267_v4 }
 0x5ac   :  { %2452 = vmatmul.mubr.msk.f32.gmra.mxu1 %vm185_vm1, %v2843_v19 }
 0x5ad   :  { %2464 = vmatpush3.xpose.msk.msra.mxu1 %vm185_vm1, %v1267_v4  ;;  %2465 = vmatprep.mubr.msk.f32.mxu1 %vm185_vm1, %v1263_v5 }
 0x5b0   :  { %2466 = vmatmul.mubr.msk.f32.vlgmr.msra.gmra.mxu1 %vm185_vm1, %v1265_v6 }
 0x65a   :  { %v2430_v7 = vpop.f32.mrf.mxu0 }
 0x65c   :  { %v881_v8 = vpop.f32.mrf.mxu0 }
 0x65d   :  { %2440 = vmatprep.mubr.msk.f32.mxu0 %vm185_vm1, %v881_v8 }
 0x65e   :  { %2441 = vmatmul.mubr.msk.f32.vlgmr.msra.gmra.mxu0 %vm185_vm1, %v2430_v7 }
 0x65f   :  { %2455 = vmatpush3.xpose.msk.msra.mxu0 %vm185_vm1, %v1178_v59 }
 0x660   :  { %2456 = vmatprep.subr.msk.mxu0 %vm185_vm1, %v1176_v61 }
 0x663   :  { %2457 = vmatpush3.xpose.msk.msra.mxu0 %vm185_vm1, %v1176_v61 }
 0x664   :  { %v2437_v9 = vpop.f32.mrf.mxu1 }
 0x666   :  { %v968_v11 = vpop.f32.mrf.mxu1 }
 0x667   :  { %2443 = vmatprep.mubr.msk.f32.mxu0 %vm185_vm1, %v968_v11 }
 0x668   :  { %2444 = vmatmul.mubr.msk.f32.gmra.mxu0 %vm185_vm1, %v2437_v9  ;;  %v2893_v13 = vpop.f32.mrf.mxu1 }
 0x669   :  { %2458 = vmatprep.mubr.msk.f32.mxu0 %vm185_vm1, %v1172_v2 }
 0x66a   :  { %v2895_v15 = vpop.f32.mrf.mxu1 }
 0x66c   :  { %2459 = vmatmul.mubr.msk.f32.vlgmr.msra.gmra.mxu0 %vm185_vm1, %v1174_v3  ;;  %v2899_v18 = vpop.f32.mrf.mxu1 }
 0x66e   :  { %v2903_v20 = vpop.f32.mrf.mxu1 }
 0x670   :  { %v2467_v23 = vpop.f32.mrf.mxu1 }
 0x671   :  { %v1362_v30 = vsel %vm358_vm2, %v2467_v23, -inf }
 0x672   :  { %v1344_v28 = vpop.f32.mrf.mxu1 }
 0x673   :  { %v1359_v29 = vsel %vm358_vm2, %v1344_v28, -inf }
 0x71e   :  { %v2897_v17 = vpop.f32.mrf.mxu0 }
 0x720   :  { %v2901_v19 = vpop.f32.mrf.mxu0 }
 0x728   :  { %v2905_v21 = vpop.f32.mrf.mxu0 }
 0x72a   :  { %v2907_v22 = vpop.f32.mrf.mxu0 }
 0x72c   :  { %v2460_v24 = vpop.f32.mrf.mxu0 }
 0x72d   :  { %v1356_v25 = vsel %vm358_vm2, %v2460_v24, -inf }
 0x72e   :  { %1357 = vmax.xlane.f32.xlu1 %v1356_v25  ;;  %v1253_v26 = vpop.f32.mrf.mxu0 }
 0x72f   :  { %v1353_v27 = vsel %vm358_vm2, %v1253_v26, -inf }
 0x730   :  { %1354 = vmax.xlane.f32.xlu0 %v1353_v27 }
 0x734   :  { %1360 = vmax.xlane.f32.xlu0 %v1359_v29 }
 0x738   :  { %1363 = vmax.xlane.f32.xlu0 %v1362_v30 }
 0x7b7   :  { %v1358_v32 = vpop.xlane.xlu1 %1357 }
 0x7b8   :  { %v1366_v35 = vsub.f32 %v2460_v24, %v1358_v32 }
 0x7b9   :  { %v1355_v31 = vpop.xlane.xlu0 %1354 }
 0x7ba   :  { %v1371_v39 = vmul.f32 1.442695, %v1366_v35  ;;  %v1365_v47 = vsub.f32 %v1253_v26, %v1355_v31 }
 0x7bc   :  { %v1369_v48 = vmul.f32 1.442695, %v1365_v47 }
 0x7bd   :  { %v1361_v33 = vpop.xlane.xlu0 %1360 }
 0x7be   :  { %v1367_v34 = vsub.f32 %v1344_v28, %v1361_v33 }
 0x7c0   :  { %v1373_v36 = vmul.f32 1.442695, %v1367_v34 }
 0x7c1   :  { %v1364_v37 = vpop.xlane.xlu0 %1363 }
 0x7c2   :  { %2575 = vpow2.f32 %v1373_v36  ;;  %v1368_v38 = vsub.f32 %v2467_v23, %v1364_v37 }
 0x7c4   :  { %v1375_v40 = vmul.f32 1.442695, %v1368_v38 }
 0x7c6   :  { %2577 = vpow2.f32 %v1375_v40 }
 0x7c7   :  { %2579 = vpow2.f32 %v1371_v39  ;;  %v1158_v39 = vadd.f32 %v2893_v13, %v2897_v17 }
 0x7c8   :  { %2581 = vpow2.f32 %v1369_v48 }
 0x7cf   :  { %v2576_v41 = vpop.eup %2575 }
 0x7d0   :  { %v1383_v42 = vsel %vm358_vm2, %v2576_v41, 0.0 }
 0x7d1   :  { %1384 = vadd.xlane.f32.xlu1 %v1383_v42  ;;  %v1153_v42 = vadd.f32 %v2895_v15, %v2901_v19 }
 0x7d3   :  { %v2578_v43 = vpop.eup %2577 }
 0x7d4   :  { %v1386_v44 = vsel %vm358_vm2, %v2578_v43, 0.0  ;;  %v2915_v45 = vpop.eup %2579 }
 0x7d5   :  { %1387 = vadd.xlane.f32.xlu0 %v1386_v44  ;;  %v1380_v46 = vsel %vm358_vm2, %v2915_v45, 0.0  ;;  %v2582_v49 = vpop.eup %2581 }
 0x7d6   :  { %v1377_v50 = vsel %vm358_vm2, %v2582_v49, 0.0 }
 0x7d9   :  { %1381 = vadd.xlane.f32.xlu0 %v1380_v46  ;;  %v1163_v46 = vadd.f32 %v2903_v20, %v2907_v22 }
 0x7e2   :  { %1399 = vrot.lane.b32.xlu1 %v2765_v10, %s2705_s15 }
 0x7e6   :  { %1486 = vrot.lane.b32.xlu1 %v2770_v14, %s2705_s15 }
 0x7ef   :  { %1397 = vrot.lane.b32.xlu0 %v2767_v12, %s2705_s15 }
 0x7f3   :  { %1678 = vrot.lane.b32.xlu0 %v2765_v10, %s2706_s16 }
 0x7f7   :  { %1769 = vrot.lane.b32.xlu0 %v2770_v14, %s2706_s16 }
 0x7fb   :  { %1674 = vrot.lane.b32.xlu0 %v2765_v10, %s2707_s17 }
 0x7ff   :  { %1763 = vrot.lane.b32.xlu0 %v2776_v16, %s2707_s17 }
 0x80a   :  { %1378 = vadd.xlane.f32.xlu1 %v1377_v50 }
 0x81b   :  { %1484 = vrot.lane.b32.xlu1 %v2776_v16, %s2705_s15 }
 0x81f   :  { %1676 = vrot.lane.b32.xlu1 %v2767_v12, %s2706_s16 }
 0x823   :  { %1672 = vrot.lane.b32.xlu1 %v2767_v12, %s2707_s17 }
 0x827   :  { %1767 = vrot.lane.b32.xlu1 %v2776_v16, %s2706_s16 }
 0x82b   :  { %1765 = vrot.lane.b32.xlu1 %v2770_v14, %s2707_s17 }
 0x85a   :  { %v1385_v51 = vpop.xlane.xlu1 %1384 }
 0x85b   :  { %2583 = vrcp.f32 %v1385_v51 }
 0x85e   :  { %v1400_v52 = vpop.permute.xlu1 %1399  ;;  %v1388_v53 = vpop.xlane.xlu0 %1387 }
 0x85f   :  { %2468 = vmatprep.subr.mxu0 %v1400_v52  ;;  %2585 = vrcp.f32 %v1388_v53 }
 0x860   :  { %2469 = vmatpush3.msra.mxu0 %v1400_v52 }
 0x862   :  { %v1487_v54 = vpop.permute.xlu1 %1486  ;;  %v1382_v55 = vpop.xlane.xlu0 %1381 }
 0x863   :  { %2475 = vmatprep.subr.mxu1 %v1487_v54  ;;  %2587 = vrcp.f32 %v1382_v55 }
 0x864   :  { %2476 = vmatpush3.msra.mxu1 %v1487_v54 }
 0x866   :  { %v1398_v56 = vpop.permute.xlu0 %1397 }
 0x867   :  { %2470 = vmatprep.subr.mxu0 %v1398_v56 }
 0x868   :  { %v2584_v58 = vpop.eup %2583  ;;  %2471 = vmatpush3.msra.mxu0 %v1398_v56 }
 0x869   :  { %v1395_v59 = vmul.f32 %v2584_v58, %v2576_v41  ;;  %2482 = vmatprep.subr.mxu0 %v177_v57 }
 0x86a   :  { %v1679_v62 = vpop.permute.xlu0 %1678 }
 0x86b   :  { %2479 = vmatprep.mubr.msk.f32.mxu1 %vm358_vm2, %v1395_v59 }
 0x86c   :  { %v2586_v61 = vpop.eup %2585 }
 0x86d   :  { %v1396_v0 = vmul.f32 %v2586_v61, %v2578_v43 }
 0x86e   :  { %v1770_v1 = vpop.permute.xlu0 %1769 }
 0x870   :  { %v2588_v4 = vpop.eup %2587 }
 0x871   :  { %v1394_v8 = vmul.f32 %v2588_v4, %v2915_v45  ;;  %v1168_v45 = vadd.f32 %v2899_v18, %v2905_v21 }
 0x872   :  { %v1675_v6 = vpop.permute.xlu0 %1674 }
 0x876   :  { %v1764_v30 = vpop.permute.xlu0 %1763 }
 0x893   :  { %v1379_v60 = vpop.xlane.xlu1 %1378 }
 0x894   :  { %2589 = vrcp.f32 %v1379_v60 }
 0x897   :  { %v1485_v63 = vpop.permute.xlu1 %1484 }
 0x898   :  { %2477 = vmatprep.subr.mxu1 %v1485_v63 }
 0x899   :  { %2478 = vmatpush3.msra.mxu1 %v1485_v63 }
 0x89a   :  { %2480 = vmatmul.mubr.msk.f32.vlgmr.msra.gmra.mxu1 %vm358_vm2, %v1396_v0  ;;  %2490 = vmatprep.subr.msk.mxu1 %vm185_vm1, %v1679_v62 }
 0x89b   :  { %v1677_v2 = vpop.permute.xlu1 %1676  ;;  %2491 = vmatpush3.xpose.msk.msra.mxu1 %vm185_vm1, %v1679_v62 }
 0x89c   :  { %2492 = vmatprep.subr.msk.mxu1 %vm185_vm1, %v1677_v2 }
 0x89f   :  { %v1673_v3 = vpop.permute.xlu1 %1672  ;;  %2493 = vmatpush3.xpose.msk.msra.mxu1 %vm185_vm1, %v1677_v2 }
 0x8a0   :  { %2494 = vmatprep.mubr.msk.f32.mxu1 %vm185_vm1, %v1673_v3 }
 0x8a1   :  { %v2590_v5 = vpop.eup %2589 }
 0x8a2   :  { %2495 = vmatmul.mubr.msk.f32.vlgmr.msra.gmra.mxu1 %vm185_vm1, %v1675_v6  ;;  %v1393_v7 = vmul.f32 %v2590_v5, %v2582_v49 }
 0x8a3   :  { %v1768_v29 = vpop.permute.xlu1 %1767 }
 0x8a4   :  { %2472 = vmatprep.mubr.msk.f32.mxu0 %vm358_vm2, %v1393_v7 }
 0x8a5   :  { %2473 = vmatmul.mubr.msk.f32.vlgmr.msra.gmra.mxu0 %vm358_vm2, %v1394_v8  ;;  %v178_v8 = vld [vmem:[#allocation7 + $0x18] sm:$0xff] }
 0x8a6   :  { %2483 = vmatpush3.msra.mxu0 %v177_v57 }
 0x8a7   :  { %2497 = vmatprep.subr.msk.mxu0 %vm185_vm1, %v1770_v1  ;;  %v1766_v31 = vpop.permute.xlu1 %1765 }
 0x95a   :  { %v2481_v9 = vpop.f32.mrf.mxu1 }
 0x95c   :  { %v1562_v11 = vpop.f32.mrf.mxu1 }
 0x962   :  { %v2496_v23 = vpop.f32.mrf.mxu1 }
 0x963   :  { %v1857_v24 = vsel %vm358_vm2, %v2496_v23, -inf }
 0x964   :  { %1858 = vmax.xlane.f32.xlu1 %v1857_v24  ;;  %v1754_v25 = vpop.f32.mrf.mxu1 }
 0x965   :  { %v2474_v26 = vpop.f32.mrf.mxu0  ;;  %v1854_v27 = vsel %vm358_vm2, %v1754_v25, -inf }
 0x966   :  { %1855 = vmax.xlane.f32.xlu0 %v1854_v27 }
 0x967   :  { %v1475_v28 = vpop.f32.mrf.mxu0 }
 0x968   :  { %2484 = vmatprep.mubr.msk.f32.mxu0 %vm185_vm1, %v1475_v28 }
 0x969   :  { %2485 = vmatmul.mubr.msk.f32.vlgmr.msra.gmra.mxu0 %vm185_vm1, %v2474_v26  ;;  %v2275_v26 = vld [vmem:[%s3014_s4] ss:$0 sm:$0xff]  ;;  %s2667_s4 = scalar_lea.vmem %s2194_s22, 512 }
 0x96a   :  { %2498 = vmatpush3.xpose.msk.msra.mxu0 %vm185_vm1, %v1770_v1  ;;  %2487 = vmatprep.mubr.msk.f32.mxu0 %vm185_vm1, %v1562_v11  ;;  %p2668_p1 = scmp.ne.s32.totalorder %s2194_s22, %s2667_s4  ;;  %p2673_p3 = scmp.lt.s32.totalorder %s2667_s4, %s2667_s4 }
 0x96b   :  { %2499 = vmatprep.subr.msk.mxu0 %vm185_vm1, %v1768_v29 }
 0x96c   :  { %p2674_p4 = por %p2673_p3, %p2672_p2 }
 0x96d   :  { %2488 = vmatmul.mubr.msk.f32.gmra.mxu0 %vm185_vm1, %v2481_v9 }
 0x96e   :  { %2500 = vmatpush3.xpose.msk.msra.mxu0 %vm185_vm1, %v1768_v29  ;;  %2501 = vmatprep.mubr.msk.f32.mxu0 %vm185_vm1, %v1764_v30  ;;  %p2675_p5 = pnand %p2674_p4, %p2668_p1 }
 0x971   :  { %2502 = vmatmul.mubr.msk.f32.vlgmr.msra.gmra.mxu0 %vm185_vm1, %v1766_v31 }
 0x9ed   :  { %v1859_v37 = vpop.xlane.xlu1 %1858 }
 0x9ee   :  { %v1867_v38 = vsub.f32 %v2496_v23, %v1859_v37 }
 0x9ef   :  { %v1856_v32 = vpop.xlane.xlu0 %1855 }
 0x9f0   :  { %v1866_v33 = vsub.f32 %v1754_v25, %v1856_v32  ;;  %v1872_v40 = vmul.f32 1.442695, %v1867_v38 }
 0x9f2   :  { %v1870_v34 = vmul.f32 1.442695, %v1866_v33 }
 0x9f4   :  { %2591 = vpow2.f32 %v1870_v34 }
 0x9f5   :  { %2593 = vpow2.f32 %v1872_v40 }
 0xa01   :  { %v2592_v35 = vpop.eup %2591 }
 0xa02   :  { %v1878_v36 = vsel %vm358_vm2, %v2592_v35, 0.0  ;;  %v2594_v18 = vpop.eup %2593 }
 0xa03   :  { %1879 = vadd.xlane.f32.xlu1 %v1878_v36  ;;  %v1881_v21 = vsel %vm358_vm2, %v2594_v18, 0.0 }
 0xa14   :  { %1900 = vrot.lane.b32.xlu1 %v2765_v10, %s2708_s18 }
 0xa18   :  { %1987 = vrot.lane.b32.xlu1 %v2770_v14, %s2708_s18 }
 0xa29   :  { %v2486_v41 = vpop.f32.mrf.mxu0 }
 0xa2a   :  { %v2964_v43 = vadd.f32 %v2486_v41, %v1158_v39 }
 0xa2b   :  { %v1649_v44 = vpop.f32.mrf.mxu0 }
 0xa2c   :  { %v2968_v10 = vadd.f32 %v1649_v44, %v1153_v42 }
 0xa2d   :  { %v2489_v14 = vpop.f32.mrf.mxu0 }
 0xa2e   :  { %v2972_v47 = vadd.f32 %v2489_v14, %v1168_v45 }
 0xa2f   :  { %v1659_v13 = vpop.f32.mrf.mxu0 }
 0xa30   :  { %v2974_v17 = vadd.f32 %v1659_v13, %v1163_v46 }
 0xa31   :  { %v2503_v48 = vpop.f32.mrf.mxu0 }
 0xa32   :  { %v1863_v49 = vsel %vm358_vm2, %v2503_v48, -inf }
 0xa33   :  { %v1845_v15 = vpop.f32.mrf.mxu0 }
 0xa34   :  { %v1860_v19 = vsel %vm358_vm2, %v1845_v15, -inf }
 0xa35   :  { %1861 = vmax.xlane.f32.xlu0 %v1860_v19 }
 0xa39   :  { %1864 = vmax.xlane.f32.xlu0 %v1863_v49 }
 0xa3d   :  { %1882 = vadd.xlane.f32.xlu0 %v1881_v21 }
 0xa8c   :  { %v1880_v50 = vpop.xlane.xlu1 %1879 }
 0xa8d   :  { %2595 = vrcp.f32 %v1880_v50 }
 0xa90   :  { %v1901_v20 = vpop.permute.xlu1 %1900 }
 0xa91   :  { %2504 = vmatprep.subr.mxu1 %v1901_v20 }
 0xa92   :  { %2505 = vmatpush3.msra.mxu1 %v1901_v20 }
 0xa94   :  { %v1988_v22 = vpop.permute.xlu1 %1987 }
 0xa95   :  { %2511 = vmatprep.subr.mxu0 %v1988_v22 }
 0xa96   :  { %2512 = vmatpush3.msra.mxu0 %v1988_v22 }
 0xa9a   :  { %v2596_v51 = vpop.eup %2595 }
 0xa9b   :  { %v1894_v52 = vmul.f32 %v2596_v51, %v2592_v35 }
 0xa9d   :  { %2508 = vmatprep.mubr.msk.f32.mxu1 %vm358_vm2, %v1894_v52 }
 0xabe   :  { %v1862_v53 = vpop.xlane.xlu0 %1861 }
 0xabf   :  { %v1868_v54 = vsub.f32 %v1845_v15, %v1862_v53 }
 0xac1   :  { %v1874_v55 = vmul.f32 1.442695, %v1868_v54 }
 0xac2   :  { %v1865_v56 = vpop.xlane.xlu0 %1864 }
 0xac3   :  { %2597 = vpow2.f32 %v1874_v55  ;;  %v1869_v57 = vsub.f32 %v2503_v48, %v1865_v56 }
 0xac5   :  { %v1876_v58 = vmul.f32 1.442695, %v1869_v57 }
 0xac6   :  { %v1883_v63 = vpop.xlane.xlu0 %1882 }
 0xac7   :  { %2599 = vpow2.f32 %v1876_v58 }
 0xac8   :  { %2601 = vrcp.f32 %v1883_v63 }
 0xad0   :  { %v2598_v59 = vpop.eup %2597 }
 0xad1   :  { %v1884_v60 = vsel %vm358_vm2, %v2598_v59, 0.0 }
 0xad2   :  { %1885 = vadd.xlane.f32.xlu1 %v1884_v60 }
 0xad4   :  { %v2600_v61 = vpop.eup %2599 }
 0xad5   :  { %v1887_v62 = vsel %vm358_vm2, %v2600_v61, 0.0  ;;  %v2602_v3 = vpop.eup %2601 }
 0xad6   :  { %1888 = vadd.xlane.f32.xlu0 %v1887_v62  ;;  %v1895_v5 = vmul.f32 %v2602_v3, %v2594_v18 }
 0xae3   :  { %1985 = vrot.lane.b32.xlu1 %v2776_v16, %s2708_s18 }
 0xaec   :  { %1898 = vrot.lane.b32.xlu0 %v2767_v12, %s2708_s18 }
 0xb5b   :  { %v1886_v0 = vpop.xlane.xlu1 %1885 }
 0xb5c   :  { %2603 = vrcp.f32 %v1886_v0 }
 0xb5f   :  { %v1986_v1 = vpop.permute.xlu1 %1985  ;;  %v1889_v2 = vpop.xlane.xlu0 %1888 }
 0xb60   :  { %2605 = vrcp.f32 %v1889_v2  ;;  %2513 = vmatprep.subr.mxu0 %v1986_v1 }
 0xb61   :  { %2514 = vmatpush3.msra.mxu0 %v1986_v1 }
 0xb63   :  { %v1899_v4 = vpop.permute.xlu0 %1898 }
 0xb64   :  { %2506 = vmatprep.subr.mxu1 %v1899_v4 }
 0xb65   :  { %2507 = vmatpush3.msra.mxu1 %v1899_v4 }
 0xb66   :  { %2509 = vmatmul.mubr.msk.f32.vlgmr.msra.gmra.mxu1 %vm358_vm2, %v1895_v5  ;;  %2518 = vmatprep.subr.mxu1 %v178_v8 }
 0xb67   :  { %2519 = vmatpush3.msra.mxu1 %v178_v8 }
 0xb69   :  { %v2604_v16 = vpop.eup %2603 }
 0xb6a   :  { %v1896_v6 = vmul.f32 %v2604_v16, %v2598_v59 }
 0xb6c   :  { %2515 = vmatprep.mubr.msk.f32.mxu0 %vm358_vm2, %v1896_v6 }
 0xb6d   :  { %v2606_v12 = vpop.eup %2605 }
 0xb6e   :  { %v1897_v7 = vmul.f32 %v2606_v12, %v2600_v61 }
 0xb70   :  { %2516 = vmatmul.mubr.msk.f32.vlgmr.msra.gmra.mxu0 %vm358_vm2, %v1897_v7 }
 0xc26   :  { %v2510_v9 = vpop.f32.mrf.mxu1 }
 0xc28   :  { %v1976_v11 = vpop.f32.mrf.mxu1 }
 0xc29   :  { %2520 = vmatprep.mubr.msk.f32.mxu1 %vm185_vm1, %v1976_v11 }
 0xc2a   :  { %2521 = vmatmul.mubr.msk.f32.vlgmr.msra.gmra.mxu1 %vm185_vm1, %v2510_v9 }
 0xc30   :  { %v2517_v23 = vpop.f32.mrf.mxu0 }
 0xc32   :  { %v2063_v24 = vpop.f32.mrf.mxu0 }
 0xc33   :  { %2523 = vmatprep.mubr.msk.f32.mxu1 %vm185_vm1, %v2063_v24 }
 0xc34   :  { %2524 = vmatmul.mubr.msk.f32.gmra.mxu1 %vm185_vm1, %v2517_v23 }
 0xcea   :  { %v2522_v25 = vpop.f32.mrf.mxu1 }
 0xceb   :  { %v2170_v27 = vadd.f32 %v2522_v25, %v2964_v43 }
 0xcec   :  { %v2150_v28 = vpop.f32.mrf.mxu1 }
 0xced   :  { %v2181_v29 = vadd.f32 %v2275_v26, %v2170_v27  ;;  %v2169_v30 = vadd.f32 %v2150_v28, %v2968_v10 }
 0xcef   :  { %2185 = vst.msk [vmem:[#allocation8 + $0x8] sm:$0xff] %vm77_vm0, %v2181_v29  ;;  %v2180_v31 = vadd.f32 %v2275_v26, %v2169_v30 }
 0xcf1   :  { %2184 = vst.msk [vmem:[#allocation8] sm:$0xff] %vm77_vm0, %v2180_v31 }
 0xcf4   :  { %v2525_v32 = vpop.f32.mrf.mxu1 }
 0xcf5   :  { %v2172_v33 = vadd.f32 %v2525_v32, %v2972_v47 }
 0xcf6   :  { %v2160_v34 = vpop.f32.mrf.mxu1 }
 0xcf7   :  { %v2183_v35 = vadd.f32 %v2275_v26, %v2172_v33  ;;  %v2171_v36 = vadd.f32 %v2160_v34, %v2974_v17 }
 0xcf9   :  { %2187 = vst.msk [vmem:[#allocation8 + $0x18] sm:$0xff] %vm77_vm0, %v2183_v35  ;;  %v2182_v37 = vadd.f32 %v2275_v26, %v2171_v36 }
 0xcfb   :  { %2186 = vst.msk [vmem:[#allocation8 + $0x10] sm:$0xff] %vm77_vm0, %v2182_v37 }
 0xcfc   :  { %2678 = shalt.err (!%p2675_p5)
}
 0xcfd   :  { %2199 = dma.vmem_to_hbm [thread:$0]  %s2194_s22, 512, %s3015_s5, [#allocation4], %s2695_s23, %s2695_s23, %s2696_s24  }
 0xcfe   :  { %2691 = dma.done.wait [#allocation4], 512  }
 0xcff   :  { %2692 = vsyncadd [#allocation4], 4294966784 }
 0xd00   :  { %2203 = vsyncpa [#allocation3], 1 }
 0xd01   :  { %2204 = vsyncpa [#allocation6], 1 }
 0xd02   :  { %2205 = vsyncpa [#allocation4], 1 }

</bundles_post_ra>
